<compile_context>
chip_gen: v7x
topology: tpu7x:2x2x1
jax: 0.10.0
libtpu: 0.0.40
codegen_flags: <defaults>
</compile_context>

<pallas_src>
import functools

import numpy as np
import jax
import jax.numpy as jnp
from jax.experimental import pallas as pl
from jax.experimental.pallas import tpu as pltpu


def _round_up(x, m):
    return (x + m - 1) // m * m


def _cdiv(a, b):
    return (a + b - 1) // b


def _textcnn_kernel(x_ref, w_ref, b_ref, m_ref, o_ref, *,
                    max_ks, chunk_t, num_chunks):
    """Fused TextCNN forward for one batch tile.

    x_ref: (tb, L_x, Cin)               input tile (bf16 or f32), time zero-padded
    w_ref: (max_ks, Cin, N_pad)         per-tap weights, branches stacked along N
    b_ref: (1, N_pad)                   stacked biases (f32)
    m_ref: (num_chunks*chunk_t, N_pad)  additive validity mask (0 / -1e30, f32)
    o_ref: (tb, N_pad)                  pooled + bias + ReLU output (f32)
    """
    tb = x_ref.shape[0]
    n_pad = o_ref.shape[1]

    running = jnp.full((tb, n_pad), -1e30, jnp.float32)
    for c in range(num_chunks):                 # static, small trip count
        t0 = c * chunk_t
        # conv taps -> per-tap MXU matmuls accumulated in f32 (in-kernel im2col)
        acc = jax.lax.dot_general(
            x_ref[:, t0:t0 + chunk_t, :], w_ref[0],
            dimension_numbers=(((2,), (0,)), ((), ())),
            preferred_element_type=jnp.float32)      # (tb, chunk_t, N_pad)
        for k in range(1, max_ks):
            acc += jax.lax.dot_general(
                x_ref[:, t0 + k:t0 + k + chunk_t, :], w_ref[k],
                dimension_numbers=(((2,), (0,)), ((), ())),
                preferred_element_type=jnp.float32)
        acc += m_ref[t0:t0 + chunk_t, :][None]       # mask invalid time slots
        running = jnp.maximum(running, jnp.max(acc, axis=1))

    # max_t relu(a_t + b) == relu(max_t a_t + b)  (both monotone) -> tiny epilogue
    o_ref[...] = jnp.maximum(running + b_ref[...], 0.0).astype(o_ref.dtype)


def stack_params(params, cin, lane_align=128):
    """Zero-pad each branch to max_ks taps, stack along Cout, pad N to 128.

    params: list of (w:(ks, Cin, Cout), b:(1, Cout), ks)
    Returns (w:(max_ks, Cin, N_pad) f32, b:(1, N_pad) f32, kernel_sizes, cout).
    """
    kernel_sizes = tuple(int(ks) for (_, _, ks) in params)
    cout = int(params[0][0].shape[2])
    n = len(kernel_sizes) * cout
    n_pad = _round_up(n, lane_align)
    max_ks = max(kernel_sizes)

    w_stacked = jnp.zeros((max_ks, cin, n_pad), jnp.float32)
    b_stacked = jnp.zeros((1, n_pad), jnp.float32)
    for j, (w, b, ks) in enumerate(params):
        w_stacked = w_stacked.at[:ks, :, j * cout:(j + 1) * cout].set(w)
        b_stacked = b_stacked.at[:, j * cout:(j + 1) * cout].set(b.reshape(1, -1))
    return w_stacked, b_stacked, kernel_sizes, cout


@functools.partial(jax.jit,
                   static_argnames=("kernel_sizes", "cout", "matmul_dtype"))
def textcnn_forward(x, w_stacked, b_stacked, *, kernel_sizes, cout,
                    matmul_dtype=jnp.bfloat16):
    """x: (B, L, Cin) channels-last.  Returns (B, n_ks*Cout), matching torch.cat."""
    b, l_in, cin = x.shape
    n_ks = len(kernel_sizes)
    max_ks, min_ks = max(kernel_sizes), min(kernel_sizes)
    assert l_in >= max_ks, "sequence shorter than the largest conv kernel"
    l_out = l_in - min_ks + 1
    n = n_ks * cout
    n_pad = w_stacked.shape[2]

    # --- time chunking: running max bounds the live accumulator ----------------
    chunk_t = min(128, _round_up(l_out, 8))
    num_chunks = _cdiv(l_out, chunk_t)
    l_out_p = num_chunks * chunk_t
    l_x = l_out_p + max_ks - 1              # padded time so every tap slice fits

    # --- bf16 MXU inputs (cast BEFORE padding / shipping), f32 accumulate ------
    if matmul_dtype is not None:
        x = x.astype(matmul_dtype)
        w_stacked = w_stacked.astype(matmul_dtype)

    # --- batch tile from a conservative VMEM working-set budget ----------------
    lane = 128
    act_bytes = jnp.dtype(x.dtype).itemsize
    cin_lanes = _round_up(cin, lane)
    per_row_bytes = (2 * l_x * cin_lanes * act_bytes   # double-buffered x tile
                     + chunk_t * n_pad * 4             # f32 chunk accumulator
                     + 3 * n_pad * 4)                  # running max + 2x out buf
    vmem_budget = 24 * 1024 * 1024                     # fits v7x (64/32 MiB) too
    tb = max(8, min(512, (vmem_budget // per_row_bytes) // 8 * 8))
    tb = min(tb, _round_up(b, 8))
    if b >= 16 and _cdiv(_round_up(b, 8), tb) < 2:     # keep both v7x TCs busy
        tb = _round_up(_cdiv(b, 2), 8)
    b_pad = _round_up(b, tb)

    # zero-pad batch to a tile multiple and time to l_x (tiny; avoids ragged tiles)
    x_pad = jnp.pad(x, ((0, b_pad - b), (0, l_x - l_in), (0, 0)))

    # --- grid-invariant additive validity mask (compile-time constant) ---------
    mask_np = np.full((l_out_p, n_pad), -1e30, np.float32)
    for j, ks in enumerate(kernel_sizes):
        mask_np[:l_in - ks + 1, j * cout:(j + 1) * cout] = 0.0
    mask = jnp.asarray(mask_np)

    kernel = functools.partial(_textcnn_kernel, max_ks=max_ks,
                               chunk_t=chunk_t, num_chunks=num_chunks)
    out = pl.pallas_call(
        kernel,
        out_shape=jax.ShapeDtypeStruct((b_pad, n_pad), jnp.float32),
        grid=(b_pad // tb,),
        in_specs=[
            pl.BlockSpec((tb, l_x, cin), lambda i: (i, 0, 0)),
            pl.BlockSpec((max_ks, cin, n_pad), lambda i: (0, 0, 0)),
            pl.BlockSpec((1, n_pad), lambda i: (0, 0)),
            pl.BlockSpec((l_out_p, n_pad), lambda i: (0, 0)),
        ],
        out_specs=pl.BlockSpec((tb, n_pad), lambda i: (i, 0)),
        compiler_params=pltpu.CompilerParams(
            dimension_semantics=("parallel",),         # batch tiles -> both TCs
            vmem_limit_bytes=32 * 1024 * 1024),
    )(x_pad, w_stacked, b_stacked, mask)
    return out[:b, :n]


def textcnn_reference(x, params):
    """Pure-JAX f32 reference mirroring the PyTorch forward."""
    outs = []
    b_sz, l_in, _ = x.shape
    for (w, b, ks) in params:
        l_out = l_in - ks + 1
        acc = jnp.zeros((b_sz, l_out, w.shape[2]), jnp.float32)
        for k in range(ks):
            acc = acc + jnp.einsum('blc,co->blo', x[:, k:k + l_out, :], w[k])
        acc = jax.nn.relu(acc + b[None, :, :])
        outs.append(jnp.max(acc, axis=1))
    return jnp.concatenate(outs, axis=1).astype(x.dtype)


def init_params(key, in_channels, out_channels, kernel_sizes):
    """Deterministic PyTorch-like (uniform) init.  Weight layout: (ks, Cin, Cout)."""
    params = []
    for ks in kernel_sizes:
        key, kw, kb = jax.random.split(key, 3)
        bound = 1.0 / jnp.sqrt(in_channels * ks)
        w = jax.random.uniform(kw, (ks, in_channels, out_channels),
                               jnp.float32, -bound, bound)
        b = jax.random.uniform(kb, (1, out_channels), jnp.float32, -bound, bound)
        params.append((w, b, ks))
    return params


if __name__ == "__main__":
    B, L = 2, 16            # batch, sequence length
    C_IN, C_OUT = 32, 32    # embedding dim, conv output channels
    KERNEL_SIZES = (3, 4, 5)

    key = jax.random.PRNGKey(0)
    key, kx = jax.random.split(key)
    x = jax.random.normal(kx, (B, L, C_IN), jnp.float32)

    params = init_params(key, C_IN, C_OUT, KERNEL_SIZES)
    w_stk, b_stk, kernel_sizes, cout = stack_params(params, C_IN)
    ref = textcnn_reference(x, params)

    # Fast path: bf16 MXU inputs, f32 accumulation.
    out = textcnn_forward(x, w_stk, b_stk, kernel_sizes=kernel_sizes, cout=cout)
    out = jax.block_until_ready(out)
    assert out.shape == (B, C_OUT * len(KERNEL_SIZES)), out.shape
    assert jnp.allclose(out, ref, atol=3e-2, rtol=3e-2), "bf16 path mismatch"

    # Exact path: f32 end-to-end (same kernel, tight tolerance).
    out32 = textcnn_forward(x, w_stk, b_stk, kernel_sizes=kernel_sizes,
                            cout=cout, matmul_dtype=None)
    out32 = jax.block_until_ready(out32)
    assert jnp.allclose(out32, ref, atol=1e-4, rtol=1e-4), "f32 path mismatch"

    print("KERNEL_OK")
</pallas_src>

<mosaic_0001>
module attributes {stable_mosaic.version = 11 : i64} {
  func.func @_textcnn_kernel(%arg0: i32, %arg1: memref<8x20x32xbf16, #tpu.memory_space<vmem>>, %arg2: memref<5x32x128xbf16, #tpu.memory_space<vmem>>, %arg3: memref<1x128xf32, #tpu.memory_space<vmem>>, %arg4: memref<16x128xf32, #tpu.memory_space<vmem>>, %arg5: memref<8x128xf32, #tpu.memory_space<vmem>>) attributes {dimension_semantics = [#tpu.dimension_semantics<parallel>], iteration_bounds = array<i64: 1>, scalar_prefetch = 0 : i64, scratch_operands = 0 : i64, tpu.core_type = #tpu.core_type<tc>, window_params = [{transform_indices = @transform_0, window_bounds = array<i64: 8, 20, 32>}, {pipeline_mode = #tpu.pipeline_mode<synchronous>, transform_indices = @transform_1, window_bounds = array<i64: 5, 32, 128>}, {pipeline_mode = #tpu.pipeline_mode<synchronous>, transform_indices = @transform_2, window_bounds = array<i64: 1, 128>}, {pipeline_mode = #tpu.pipeline_mode<synchronous>, transform_indices = @transform_3, window_bounds = array<i64: 16, 128>}, {transform_indices = @transform_4, window_bounds = array<i64: 8, 128>}]} {
    %cst = arith.constant -1.000000e+30 : f32
    %0 = vector.broadcast %cst : f32 to vector<8x128xf32>
    %c0 = arith.constant 0 : index
    %c0_0 = arith.constant 0 : index
    %c0_1 = arith.constant 0 : index
    %1 = vector.load %arg1[%c0, %c0_0, %c0_1] : memref<8x20x32xbf16, #tpu.memory_space<vmem>>, vector<8x16x32xbf16>
    %c0_2 = arith.constant 0 : index
    %c0_3 = arith.constant 0 : index
    %c0_4 = arith.constant 0 : index
    %2 = vector.load %arg2[%c0_2, %c0_3, %c0_4] : memref<5x32x128xbf16, #tpu.memory_space<vmem>>, vector<1x32x128xbf16>
    %3 = vector.shape_cast %2 : vector<1x32x128xbf16> to vector<32x128xbf16>
    %cst_5 = arith.constant dense<0.000000e+00> : vector<8x16x128xf32>
    %4 = tpu.matmul %1, %3, %cst_5 {dimension_numbers = #tpu.dot_dimension_numbers<[2], [0], [0, 1], [1], [0, 0, 0, 1, 1, 1], [], []>} : vector<8x16x32xbf16>, vector<32x128xbf16>, vector<8x16x128xf32> -> vector<8x16x128xf32>
    %c0_6 = arith.constant 0 : index
    %c1 = arith.constant 1 : index
    %c0_7 = arith.constant 0 : index
    %5 = vector.load %arg1[%c0_6, %c1, %c0_7] : memref<8x20x32xbf16, #tpu.memory_space<vmem>>, vector<8x16x32xbf16>
    %c1_8 = arith.constant 1 : index
    %c0_9 = arith.constant 0 : index
    %c0_10 = arith.constant 0 : index
    %6 = vector.load %arg2[%c1_8, %c0_9, %c0_10] : memref<5x32x128xbf16, #tpu.memory_space<vmem>>, vector<1x32x128xbf16>
    %7 = vector.shape_cast %6 : vector<1x32x128xbf16> to vector<32x128xbf16>
    %cst_11 = arith.constant dense<0.000000e+00> : vector<8x16x128xf32>
    %8 = tpu.matmul %5, %7, %cst_11 {dimension_numbers = #tpu.dot_dimension_numbers<[2], [0], [0, 1], [1], [0, 0, 0, 1, 1, 1], [], []>} : vector<8x16x32xbf16>, vector<32x128xbf16>, vector<8x16x128xf32> -> vector<8x16x128xf32>
    %9 = arith.addf %4, %8 : vector<8x16x128xf32>
    %c0_12 = arith.constant 0 : index
    %c2 = arith.constant 2 : index
    %c0_13 = arith.constant 0 : index
    %10 = vector.load %arg1[%c0_12, %c2, %c0_13] : memref<8x20x32xbf16, #tpu.memory_space<vmem>>, vector<8x16x32xbf16>
    %c2_14 = arith.constant 2 : index
    %c0_15 = arith.constant 0 : index
    %c0_16 = arith.constant 0 : index
    %11 = vector.load %arg2[%c2_14, %c0_15, %c0_16] : memref<5x32x128xbf16, #tpu.memory_space<vmem>>, vector<1x32x128xbf16>
    %12 = vector.shape_cast %11 : vector<1x32x128xbf16> to vector<32x128xbf16>
    %cst_17 = arith.constant dense<0.000000e+00> : vector<8x16x128xf32>
    %13 = tpu.matmul %10, %12, %cst_17 {dimension_numbers = #tpu.dot_dimension_numbers<[2], [0], [0, 1], [1], [0, 0, 0, 1, 1, 1], [], []>} : vector<8x16x32xbf16>, vector<32x128xbf16>, vector<8x16x128xf32> -> vector<8x16x128xf32>
    %14 = arith.addf %9, %13 : vector<8x16x128xf32>
    %c0_18 = arith.constant 0 : index
    %c3 = arith.constant 3 : index
    %c0_19 = arith.constant 0 : index
    %15 = vector.load %arg1[%c0_18, %c3, %c0_19] : memref<8x20x32xbf16, #tpu.memory_space<vmem>>, vector<8x16x32xbf16>
    %c3_20 = arith.constant 3 : index
    %c0_21 = arith.constant 0 : index
    %c0_22 = arith.constant 0 : index
    %16 = vector.load %arg2[%c3_20, %c0_21, %c0_22] : memref<5x32x128xbf16, #tpu.memory_space<vmem>>, vector<1x32x128xbf16>
    %17 = vector.shape_cast %16 : vector<1x32x128xbf16> to vector<32x128xbf16>
    %cst_23 = arith.constant dense<0.000000e+00> : vector<8x16x128xf32>
    %18 = tpu.matmul %15, %17, %cst_23 {dimension_numbers = #tpu.dot_dimension_numbers<[2], [0], [0, 1], [1], [0, 0, 0, 1, 1, 1], [], []>} : vector<8x16x32xbf16>, vector<32x128xbf16>, vector<8x16x128xf32> -> vector<8x16x128xf32>
    %19 = arith.addf %14, %18 : vector<8x16x128xf32>
    %c0_24 = arith.constant 0 : index
    %c4 = arith.constant 4 : index
    %c0_25 = arith.constant 0 : index
    %20 = vector.load %arg1[%c0_24, %c4, %c0_25] : memref<8x20x32xbf16, #tpu.memory_space<vmem>>, vector<8x16x32xbf16>
    %c4_26 = arith.constant 4 : index
    %c0_27 = arith.constant 0 : index
    %c0_28 = arith.constant 0 : index
    %21 = vector.load %arg2[%c4_26, %c0_27, %c0_28] : memref<5x32x128xbf16, #tpu.memory_space<vmem>>, vector<1x32x128xbf16>
    %22 = vector.shape_cast %21 : vector<1x32x128xbf16> to vector<32x128xbf16>
    %cst_29 = arith.constant dense<0.000000e+00> : vector<8x16x128xf32>
    %23 = tpu.matmul %20, %22, %cst_29 {dimension_numbers = #tpu.dot_dimension_numbers<[2], [0], [0, 1], [1], [0, 0, 0, 1, 1, 1], [], []>} : vector<8x16x32xbf16>, vector<32x128xbf16>, vector<8x16x128xf32> -> vector<8x16x128xf32>
    %24 = arith.addf %19, %23 : vector<8x16x128xf32>
    %c0_30 = arith.constant 0 : index
    %c0_31 = arith.constant 0 : index
    %25 = vector.load %arg4[%c0_30, %c0_31] : memref<16x128xf32, #tpu.memory_space<vmem>>, vector<16x128xf32>
    %26 = vector.shape_cast %25 : vector<16x128xf32> to vector<1x16x128xf32>
    %27 = vector.broadcast %26 : vector<1x16x128xf32> to vector<8x16x128xf32>
    %28 = arith.addf %24, %27 : vector<8x16x128xf32>
    %cst_32 = arith.constant dense<0xFF800000> : vector<8x128xf32>
    %29 = vector.multi_reduction <maximumf>, %28, %cst_32 [1] : vector<8x16x128xf32> to vector<8x128xf32>
    %30 = arith.maximumf %0, %29 : vector<8x128xf32>
    %c0_33 = arith.constant 0 : index
    %c0_34 = arith.constant 0 : index
    %31 = vector.load %arg3[%c0_33, %c0_34] : memref<1x128xf32, #tpu.memory_space<vmem>>, vector<1x128xf32>
    %32 = vector.broadcast %31 : vector<1x128xf32> to vector<8x128xf32>
    %33 = arith.addf %30, %32 : vector<8x128xf32>
    %cst_35 = arith.constant 0.000000e+00 : f32
    %34 = vector.broadcast %cst_35 : f32 to vector<8x128xf32>
    %35 = arith.maximumf %33, %34 : vector<8x128xf32>
    %c0_36 = arith.constant 0 : index
    %c0_37 = arith.constant 0 : index
    %36 = vector.load %arg5[%c0_36, %c0_37] : memref<8x128xf32, #tpu.memory_space<vmem>>, vector<8x128xf32>
    tpu.vector_store %arg5[%c0_36, %c0_37], %35 {strides = array<i32>} : memref<8x128xf32, #tpu.memory_space<vmem>>, vector<8x128xf32>,
    return
  }
  func.func @transform_0(%arg0: i32) -> (i32, i32, i32) {
    %c0_i32 = arith.constant 0 : i32
    %c0_i32_0 = arith.constant 0 : i32
    %c0_i32_1 = arith.constant 0 : i32
    return %arg0, %c0_i32, %c0_i32_0 : i32, i32, i32
  }
  func.func @transform_1(%arg0: i32) -> (i32, i32, i32) {
    %c0_i32 = arith.constant 0 : i32
    %c0_i32_0 = arith.constant 0 : i32
    %c0_i32_1 = arith.constant 0 : i32
    %c0_i32_2 = arith.constant 0 : i32
    return %c0_i32, %c0_i32_0, %c0_i32_1 : i32, i32, i32
  }
  func.func @transform_2(%arg0: i32) -> (i32, i32) {
    %c0_i32 = arith.constant 0 : i32
    %c0_i32_0 = arith.constant 0 : i32
    %c0_i32_1 = arith.constant 0 : i32
    return %c0_i32, %c0_i32_0 : i32, i32
  }
  func.func @transform_3(%arg0: i32) -> (i32, i32) {
    %c0_i32 = arith.constant 0 : i32
    %c0_i32_0 = arith.constant 0 : i32
    %c0_i32_1 = arith.constant 0 : i32
    return %c0_i32, %c0_i32_0 : i32, i32
  }
  func.func @transform_4(%arg0: i32) -> (i32, i32) {
    %c0_i32 = arith.constant 0 : i32
    %c0_i32_0 = arith.constant 0 : i32
    return %arg0, %c0_i32 : i32, i32
  }
}

</mosaic_0001>

<bundles_post_ra>
// kernel: textcnn_forward.1
= control target key start
LH: loop header
LB: loop body
LE: loop exit
PB: predicated region body
PF: predicated region fallthrough
CT: control target
= control target key end

     0   :  { %vm606_vm0 = vcmask 1042432   ;;  %vm607_vm1 = vcmask 1046532   ;;  %vm282_vm2 = vcmask 261120   ;;  %vm51_vm4 = vsmask.f32 3328  ;;  %s2683_s1 = inlined_call_operand.vmem [shape: bf16[5,32,128], index: 1, kind: input, shape index: {}]   ;;  %s2684_s0 = inlined_call_operand.vmem [shape: bf16[8,20,32], index: 0, kind: input, shape index: {}]   ;;  %s2685_s3 = inlined_call_operand.vmem [shape: f32[16,128], index: 3, kind: input, shape index: {}]   ;;  %s2686_s2 = inlined_call_operand.vmem [shape: f32[1,128], index: 2, kind: input, shape index: {}]   ;;  %s2687_s4 = inlined_call_operand.vmem [shape: f32[8,128], index: 4, kind: output, shape index: {}]  }
   0x1   :  { %v1999_v0 = vld [vmem:[%s2683_s1 + $0x20] sm:$0xff]   ;;  %v1954_v1 = vld [vmem:[%s2683_s1 + $0x10] sm:$0xff]   ;;  %v2008_v2 = vld [vmem:[%s2683_s1 + $0x28] sm:$0xff]   ;;  %vm52_vm5 = vsmask.f32 7440  ;;  %vm1240_vm10 = vcmask 1041408  }
   0x2   :  { %1825 = vmatprep.subr.bf16.mxu0 %v1999_v0  ;;  %1785 = vmatprep.subr.bf16.mxu1 %v1954_v1  ;;  %v1956_v3 = vld [vmem:[%s2683_s1 + $0x18] sm:$0xff]   ;;  %v2018_v4 = vld [vmem:[%s2684_s0 + $0x4] sm:$0xf]  ;;  %v38_v5 = vld [vmem:[%s2684_s0 + $0x8] sm:$0x1]  ;;  %vm1241_vm11 = vcmask 1045508  }
   0x3   :  { %1826 = vmatpush3.bf16.msra.mxu0 %v1999_v0  ;;  %1786 = vmatpush3.bf16.msra.mxu1 %v1954_v1  ;;  %v577_v6 = vld [vmem:[%s2684_s0] sm:$0xe]  ;;  %vm2026_vm3 = vmor %vm606_vm0, %vm607_vm1  ;;  %v611_v9 = vrot.slane %v2018_v4, 5  ;;  %v614_v10 = vrot.slane %v38_v5, 5  ;;  %v2034_v12 = vld [vmem:[%s2684_s0 + $0x10] sm:$0xf] }
   0x4   :  { %1827 = vmatprep.subr.bf16.mxu0 %v2008_v2  ;;  %1787 = vmatprep.subr.bf16.mxu1 %v1956_v3  ;;  %v1656_v8 = vrot.slane %v577_v6, 9  ;;  %v855_v11 = vshrl.u32 %v577_v6, 16  ;;  %v858_v13 = vshll.u32 %v577_v6, 16  ;;  %v2039_v14 = vld [vmem:[%s2684_s0 + $0x14] sm:$0x1]  ;;  %v618_v16 = vrot.slane %v2034_v12, 5  ;;  %vm2113_vm6 = vmor %vm51_vm4, %vm52_vm5 }
   0x5   :  { %v578_v15 = vld [vmem:[%s2684_s0 + $0xc] sm:$0xe]  ;;  %v613_v18 = vrot.slane %v611_v9, 4  ;;  %v2053_v21 = vld [vmem:[%s2684_s0] sm:$0xf]  ;;  %v621_v25 = vrot.slane %v2039_v14, 5  ;;  %vm2500_vm12 = vmor %vm1240_vm10, %vm1241_vm11 }
   0x6   :  { %v612_v17 = vsel %vm2026_vm3, %v1656_v8, %v611_v9  ;;  %v2048_v19 = vrot.slane %v855_v11, 5  ;;  %v1657_v20 = vrot.slane %v578_v15, 9  ;;  %v2058_v22 = vld [vmem:[%s2683_s1] sm:$0xff]   ;;  %v2060_v23 = vrot.slane %v858_v13, 6  ;;  %v1958_v30 = vld [vmem:[%s2683_s1 + $0x30] sm:$0xff]   ;;  %v1959_v40 = vld [vmem:[%s2683_s1 + $0x38] sm:$0xff]  }
   0x7   :  { %1828 = vmatpush3.bf16.msra.mxu0 %v2008_v2  ;;  %1788 = vmatpush3.bf16.msra.mxu1 %v1956_v3  ;;  %v620_v24 = vrot.slane %v618_v16, 4  ;;  %v878_v26 = vshrl.u32 %v578_v15, 16  ;;  %v615_v27 = vsel %vm2026_vm3, %v613_v18, %v614_v10  ;;  %v881_v29 = vshll.u32 %v578_v15, 16  ;;  %v2079_v39 = vld [vmem:[%s2684_s0 + $0xc] sm:$0xf]  ;;  %v2109_v59 = vld [vmem:[%s2683_s1 + $0x40] sm:$0xff]  }
   0x8   :  { %v619_v28 = vsel %vm2026_vm3, %v1657_v20, %v618_v16  ;;  %1805 = vmatprep.subr.bf16.mxu1 %v2058_v22  ;;  %v1664_v31 = vcombine.low %v612_v17, %v615_v27  ;;  %v55_v34 = vshrl.u32 %v2053_v21, 16  ;;  %v58_v37 = vshll.u32 %v2053_v21, 16  ;;  %1845 = vmatprep.subr.bf16.mxu0 %v1958_v30  ;;  %v2095_v53 = vld [vmem:[%s2684_s0 + $0x18] sm:$0xe]  ;;  %v2104_v58 = vld [vmem:[%s2684_s0 + $0x1c] sm:$0xf] }
   0x9   :  { %v622_v32 = vsel %vm2026_vm3, %v620_v24, %v621_v25  ;;  %v880_v33 = vrot.slane %v878_v26, 5  ;;  %v883_v36 = vrot.slane %v881_v29, 6  ;;  %v64_v38 = vshll.u32 %v2018_v4, 16  ;;  %v40_v1 = vld [vmem:[%s2684_s0 + $0x20] sm:$0x1] }
   0xa   :  { %v1665_v35 = vcombine.low %v619_v28, %v622_v32  ;;  %1829 = vmatprep.mubr.msk.bf16.mxu0 %vm282_vm2, %v1664_v31  ;;  %v57_v41 = vrot.slane %v55_v34, 4  ;;  %v68_v42 = vshrl.u32 %v2018_v4, 16  ;;  %v74_v43 = vshll.u32 %v38_v5, 16  ;;  %v2126_v10 = vld [vmem:[%s2684_s0 + $0x28] sm:$0xf] }
   0xb   :  { %v79_v44 = vshrl.u32 %v2079_v39, 16  ;;  %v884_v45 = vor.u32 %v883_v36, %v880_v33  ;;  %v60_v46 = vrot.slane %v58_v37, 5  ;;  %v66_v47 = vrot.slane %v64_v38, 5  ;;  %v2131_v11 = vld [vmem:[%s2684_s0 + $0x24] sm:$0xe] }
   0xc   :  { %1830 = vmatmul.mubr.msk.bf16.vlgmr.msra.gmra.mrb[0].mxu0 %vm282_vm2, %v1665_v35  ;;  %v2088_v48 = vrot.slane %v64_v38, 6  ;;  %v70_v49 = vrot.slane %v68_v42, 4  ;;  %v76_v50 = vrot.slane %v74_v43, 5  ;;  %v2090_v51 = vrot.slane %v68_v42, 5  ;;  %v2136_v17 = vld [vmem:[%s2684_s0 + $0x2c] sm:$0x1] }
   0xd   :  { %v81_v52 = vrot.slane %v79_v44, 4  ;;  %1846 = vmatpush3.bf16.msra.mxu0 %v1958_v30  ;;  %v2097_v54 = vrot.slane %v884_v45, 4  ;;  %v61_v55 = vor.u32 %v60_v46, %v57_v41  ;;  %v82_v56 = vshll.u32 %v2079_v39, 16  ;;  %v2150_v30 = vld [vmem:[%s2684_s0 + $0x18] sm:$0xf] }
   0xe   :  { %v88_v57 = vshll.u32 %v2034_v12, 16  ;;  %1847 = vmatprep.subr.bf16.mxu0 %v1959_v40  ;;  %v71_v61 = vor.u32 %v70_v49, %v66_v47  ;;  %v92_v62 = vshrl.u32 %v2034_v12, 16  ;;  %v98_v63 = vshll.u32 %v2039_v14, 16  ;;  %v2167_v44 = vld [vmem:[%s2684_s0 + $0x24] sm:$0xf] }
   0xf   :  { %v1658_v3 = vrot.slane %v2095_v53, 9  ;;  %v62_v5 = vrot.slane %v61_v55, 4  ;;  %v84_v6 = vrot.slane %v82_v56, 5  ;;  %v625_v24 = vrot.slane %v2104_v58, 5 }
  0x10   :  { %v90_v8 = vrot.slane %v88_v57, 5  ;;  %v887_v9 = vrot.slane %v88_v57, 6  ;;  %v72_v13 = vrot.slane %v71_v61, 4  ;;  %v94_v14 = vrot.slane %v92_v62, 4  ;;  %v1960_v57 = vld [vmem:[%s2683_s1 + $0x8] sm:$0xff]  }
  0x11   :  { %v100_v15 = vrot.slane %v98_v63, 5  ;;  %v886_v16 = vrot.slane %v92_v62, 5  ;;  %1848 = vmatpush3.bf16.msra.mxu0 %v1959_v40  ;;  %v67_v18 = vsel %vm2113_vm6, %v62_v5, %v66_v47  ;;  %v85_v20 = vor.u32 %v84_v6, %v81_v52 }
  0x12   :  { %v628_v25 = vrot.slane %v40_v1, 5  ;;  %1865 = vmatprep.subr.bf16.mxu0 %v2109_v59  ;;  %v77_v26 = vsel %vm2113_vm6, %v72_v13, %v76_v50  ;;  %v95_v27 = vor.u32 %v94_v14, %v90_v8  ;;  %v1659_v29 = vrot.slane %v2131_v11, 9 }
  0x13   :  { %v2144_v28 = vor.u32 %v887_v9, %v886_v16  ;;  %v1616_v31 = vcombine.low %v67_v18, %v77_v26  ;;  %v86_v32 = vrot.slane %v85_v20, 4  ;;  %v626_v33 = vsel %vm2026_vm3, %v1658_v3, %v625_v24 }
  0x14   :  { %v627_v34 = vrot.slane %v625_v24, 4  ;;  %v96_v35 = vrot.slane %v95_v27, 4  ;;  %v632_v37 = vrot.slane %v2126_v10, 5  ;;  %v635_v38 = vrot.slane %v2136_v17, 5 }
  0x15   :  { %v890_v36 = vrot.slane %v2144_v28, 4  ;;  %1789 = vmatprep.mubr.msk.bf16.mxu1 %vm282_vm2, %v1616_v31  ;;  %v91_v40 = vsel %vm2113_vm6, %v86_v32, %v90_v8  ;;  %v103_v42 = vshrl.u32 %v2150_v30, 16  ;;  %v106_v43 = vshll.u32 %v2150_v30, 16  ;;  %v1214_v32 = vld [vmem:[%s2684_s0 + $0x24] sm:$0xc] }
  0x16   :  { %v629_v41 = vsel %vm2026_vm3, %v627_v34, %v628_v25  ;;  %v101_v45 = vsel %vm2113_vm6, %v96_v35, %v100_v15  ;;  %v633_v47 = vsel %vm2026_vm3, %v1659_v29, %v632_v37  ;;  %v634_v49 = vrot.slane %v632_v37, 4  ;;  %v2196_v25 = vld [vmem:[%s2684_s0 + $0x8] sm:$0x3] }
  0x17   :  { %v1666_v46 = vcombine.low %v626_v33, %v629_v41  ;;  %v1617_v50 = vcombine.low %v91_v40, %v101_v45  ;;  %v105_v52 = vrot.slane %v103_v42, 4  ;;  %v108_v55 = vrot.slane %v106_v43, 5  ;;  %v2217_v42 = vld [vmem:[%s2684_s0 + $0x14] sm:$0x3] }
  0x18   :  { %v112_v56 = vshll.u32 %v2104_v58, 16  ;;  %v636_v61 = vsel %vm2026_vm3, %v634_v49, %v635_v38  ;;  %v116_v62 = vshrl.u32 %v2104_v58, 16  ;;  %v122_v63 = vshll.u32 %v40_v1, 16 }
  0x19   :  { %1833 = vmatprep.mubr.msk.bf16.mxu0 %vm282_vm2, %v1666_v46  ;;  %v127_v3 = vshrl.u32 %v2167_v44, 16  ;;  %1790 = vmatmul.mubr.msk.bf16.vlgmr.msra.gmra.mrb[0].mxu1 %vm282_vm2, %v1617_v50  ;;  %v1667_v5 = vcombine.low %v633_v47, %v636_v61  ;;  %v109_v6 = vor.u32 %v108_v55, %v105_v52  ;;  %v130_v9 = vshll.u32 %v2167_v44, 16  ;;  %v2234_v46 = vld [vmem:[%s2684_s0 + $0x34] sm:$0xf]  ;;  %v2241_v52 = vld [vmem:[%s2684_s0 + $0x38] sm:$0x1] }
  0x1a   :  { %v114_v8 = vrot.slane %v112_v56, 5  ;;  %1806 = vmatpush3.bf16.msra.mxu1 %v2058_v22  ;;  %v118_v13 = vrot.slane %v116_v62, 4  ;;  %v124_v14 = vrot.slane %v122_v63, 5  ;;  %v136_v1 = vshll.u32 %v2126_v10, 16 }
  0x1b   :  { %v129_v15 = vrot.slane %v127_v3, 4  ;;  %1834 = vmatmul.mubr.msk.bf16.gmra.mrb[4].mxu0 %vm282_vm2, %v1667_v5  ;;  %v110_v16 = vrot.slane %v109_v6, 4  ;;  %v132_v18 = vrot.slane %v130_v9, 5  ;;  %v140_v20 = vshrl.u32 %v2126_v10, 16  ;;  %1807 = vmatprep.subr.bf16.mxu1 %v1960_v57  ;;  %v2251_v3 = vld [vmem:[%s2684_s0 + $0x3c] sm:$0xf] }
  0x1c   :  { %v146_v24 = vshll.u32 %v2136_v17, 16  ;;  %v119_v22 = vor.u32 %v118_v13, %v114_v8  ;;  %v138_v26 = vrot.slane %v136_v1, 5  ;;  %vm851_vm7 = vsmask.f32 2304 }
  0x1d   :  { %vm852_vm8 = vsmask.f32 6416  ;;  %v115_v27 = vsel %vm2113_vm6, %v110_v16, %v114_v8  ;;  %v133_v29 = vor.u32 %v132_v18, %v129_v15  ;;  %v142_v31 = vrot.slane %v140_v20, 4  ;;  %v2261_v18 = vld [vmem:[%s2684_s0 + $0x40] sm:$0xf] }
  0x1e   :  { %v148_v17 = vrot.slane %v146_v24, 5  ;;  %vm2204_vm9 = vmor %vm851_vm7, %vm852_vm8  ;;  %v120_v33 = vrot.slane %v119_v22, 4  ;;  %v861_v34 = vor.u32 %v2060_v23, %v2048_v19  ;;  %v865_v35 = vor.u32 %v2088_v48, %v2090_v51  ;;  %1808 = vmatpush3.bf16.msra.mxu1 %v1960_v57  ;;  %v2226_v23 = vld [vmem:[%s2684_s0 + $0x30] sm:$0xf] }
  0x1f   :  { %v869_v37 = vshrl.u32 %v2196_v25, 16  ;;  %v134_v38 = vrot.slane %v133_v29, 4  ;;  %v143_v40 = vor.u32 %v142_v31, %v138_v26  ;;  %v872_v41 = vshll.u32 %v2196_v25, 16  ;;  %1885 = vmatprep.subr.bf16.mxu1 %v1999_v0 }
  0x20   :  { %v889_v19 = vsel %vm2204_vm9, %v2097_v54, %v2144_v28  ;;  %v125_v48 = vsel %vm2113_vm6, %v120_v33, %v124_v14  ;;  %v862_v51 = vrot.slane %v861_v34, 4  ;;  %v867_v43 = vrot.slane %v865_v35, 4 }
  0x21   :  { %v871_v45 = vrot.slane %v869_v37, 5  ;;  %v1618_v47 = vcombine.low %v115_v27, %v125_v48  ;;  %v139_v54 = vsel %vm2113_vm6, %v134_v38, %v138_v26  ;;  %v144_v49 = vrot.slane %v143_v40, 4  ;;  %v2276_v37 = vld [vmem:[%s2684_s0 + $0x44] sm:$0x1] }
  0x22   :  { %v874_v50 = vrot.slane %v872_v41, 6  ;;  %v866_v55 = vsel %vm2204_vm9, %v862_v51, %v865_v35  ;;  %v892_v57 = vshrl.u32 %v2217_v42, 16  ;;  %v895_v61 = vshll.u32 %v2217_v42, 16 }
  0x23   :  { %v151_v63 = vshrl.u32 %v2226_v23, 16  ;;  %1793 = vmatprep.mubr.msk.bf16.mxu1 %vm282_vm2, %v1618_v47  ;;  %v149_v5 = vsel %vm2113_vm6, %v144_v49, %v148_v17  ;;  %v154_v8 = vshll.u32 %v2226_v23, 16  ;;  %v160_v9 = vshll.u32 %v2234_v46, 16 }
  0x24   :  { %v875_v6 = vor.u32 %v874_v50, %v871_v45  ;;  %v1619_v13 = vcombine.low %v139_v54, %v149_v5  ;;  %v894_v14 = vrot.slane %v892_v57, 5  ;;  %v897_v15 = vrot.slane %v895_v61, 6  ;;  %v1963_v50 = vld [vmem:[%s2683_s1 + $0x48] sm:$0xff]  }
  0x25   :  { %v153_v16 = vrot.slane %v151_v63, 4  ;;  %v156_v22 = vrot.slane %v154_v8, 5  ;;  %v162_v26 = vrot.slane %v160_v9, 5  ;;  %v164_v27 = vshrl.u32 %v2234_v46, 16  ;;  %v2300_v63 = vld [vmem:[%s2684_s0 + $0x20] sm:$0x3] }
  0x26   :  { %v876_v24 = vsel %vm2204_vm9, %v867_v43, %v875_v6  ;;  %1794 = vmatmul.mubr.msk.bf16.gmra.mrb[4].mxu1 %vm282_vm2, %v1619_v13  ;;  %v898_v31 = vor.u32 %v897_v15, %v894_v14  ;;  %v170_v17 = vshll.u32 %v2241_v52, 16  ;;  %v175_v33 = vshrl.u32 %v2251_v3, 16 }
  0x27   :  { %v1686_v29 = vcombine.low %v866_v55, %v876_v24  ;;  %v157_v34 = vor.u32 %v156_v22, %v153_v16  ;;  %v166_v35 = vrot.slane %v164_v27, 4  ;;  %v178_v38 = vshll.u32 %v2251_v3, 16 }
  0x28   :  { %v184_v40 = vshll.u32 %v2261_v18, 16  ;;  %v899_v41 = vsel %vm2204_vm9, %v890_v36, %v898_v31  ;;  %v172_v48 = vrot.slane %v170_v17, 5  ;;  %v177_v51 = vrot.slane %v175_v33, 4 }
  0x29   :  { %1849 = vmatprep.mubr.msk.bf16.mxu0 %vm282_vm2, %v1686_v29  ;;  %v188_v43 = vshrl.u32 %v2261_v18, 16  ;;  %v1687_v45 = vcombine.low %v889_v19, %v899_v41  ;;  %v158_v47 = vrot.slane %v157_v34, 4  ;;  %v167_v54 = vor.u32 %v166_v35, %v162_v26 }
  0x2a   :  { %v180_v49 = vrot.slane %v178_v38, 5  ;;  %v186_v55 = vrot.slane %v184_v40, 5  ;;  %v194_v36 = vshll.u32 %v2276_v37, 16  ;;  %v901_v5 = vshrl.u32 %v2095_v53, 16  ;;  %v2322_v38 = vld [vmem:[%s2684_s0 + $0x2c] sm:$0x3] }
  0x2b   :  { %v190_v28 = vrot.slane %v188_v43, 4  ;;  %1850 = vmatmul.mubr.msk.bf16.vlgmr.msra.gmra.mrb[0].mxu0 %vm282_vm2, %v1687_v45  ;;  %v163_v19 = vsel %vm2113_vm6, %v158_v47, %v162_v26  ;;  %v168_v57 = vrot.slane %v167_v54, 4  ;;  %v904_v13 = vshll.u32 %v2095_v53, 16 }
  0x2c   :  { %v181_v61 = vor.u32 %v180_v49, %v177_v51  ;;  %v196_v8 = vrot.slane %v194_v36, 5  ;;  %1866 = vmatpush3.bf16.msra.mxu0 %v2109_v59  ;;  %v909_v14 = vrot.slane %v116_v62, 5  ;;  %v903_v24 = vrot.slane %v901_v5, 5 }
  0x2d   :  { %v191_v6 = vor.u32 %v190_v28, %v186_v55  ;;  %v173_v15 = vsel %vm2113_vm6, %v168_v57, %v172_v48  ;;  %v910_v22 = vrot.slane %v112_v56, 6  ;;  %1867 = vmatprep.subr.bf16.mxu0 %v1963_v50  ;;  %v906_v31 = vrot.slane %v904_v13, 6  ;;  %v2328_v48 = vld [vmem:[%s2684_s0 + $0x48] sm:$0xf] }
  0x2e   :  { %v182_v16 = vrot.slane %v181_v61, 4  ;;  %v1620_v26 = vcombine.low %v163_v19, %v173_v15  ;;  %v915_v17 = vshrl.u32 %v2300_v63, 16  ;;  %v918_v62 = vshll.u32 %v2300_v63, 16 }
  0x2f   :  { %v192_v29 = vrot.slane %v191_v6, 4  ;;  %v911_v59 = vor.u32 %v910_v22, %v909_v14  ;;  %v924_v33 = vshrl.u32 %v2131_v11, 16  ;;  %v907_v56 = vor.u32 %v906_v31, %v903_v24  ;;  %v2356_v24 = vld [vmem:[%s2684_s0 + $0x54] sm:$0xf] }
  0x30   :  { %v187_v53 = vsel %vm2113_vm6, %v182_v16, %v186_v55  ;;  %1797 = vmatprep.mubr.msk.bf16.mxu1 %vm282_vm2, %v1620_v26  ;;  %v917_v35 = vrot.slane %v915_v17, 5  ;;  %v927_v41 = vshll.u32 %v2131_v11, 16  ;;  %1868 = vmatpush3.bf16.msra.mxu0 %v1963_v50  ;;  %v920_v47 = vrot.slane %v918_v62, 6 }
  0x31   :  { %v197_v34 = vsel %vm2113_vm6, %v192_v29, %v196_v8  ;;  %v913_v45 = vrot.slane %v911_v59, 4  ;;  %v926_v54 = vrot.slane %v924_v33, 5  ;;  %v908_v49 = vrot.slane %v907_v56, 4  ;;  %v2367_v56 = vld [vmem:[%s2684_s0 + $0x58] sm:$0xf] }
  0x32   :  { %v1621_v51 = vcombine.low %v187_v53, %v197_v34  ;;  %v929_v55 = vrot.slane %v927_v41, 6  ;;  %v932_v28 = vrot.slane %v140_v20, 5  ;;  %v933_v36 = vrot.slane %v136_v1, 6  ;;  %v2343_v20 = vld [vmem:[%s2684_s0 + $0x4c] sm:$0xf] }
  0x33   :  { %v921_v11 = vor.u32 %v920_v47, %v917_v35  ;;  %v938_v19 = vshrl.u32 %v2322_v38, 16  ;;  %v941_v57 = vshll.u32 %v2322_v38, 16  ;;  %v199_v50 = vshrl.u32 %v2328_v48, 16  ;;  %v2348_v1 = vld [vmem:[%s2684_s0 + $0x50] sm:$0x1] }
  0x34   :  { %1798 = vmatmul.mubr.msk.bf16.gmra.mrb[8].mxu1 %vm282_vm2, %v1621_v51  ;;  %v912_v61 = vsel %vm2204_vm9, %v908_v49, %v911_v59  ;;  %v930_v5 = vor.u32 %v929_v55, %v926_v54  ;;  %v934_v6 = vor.u32 %v933_v36, %v932_v28  ;;  %v202_v8 = vshll.u32 %v2328_v48, 16  ;;  %v2372_v35 = vld [vmem:[%s2684_s0 + $0x5c] sm:$0x1]  ;;  %v2385_v55 = vld [vmem:[%s2684_s0 + $0x30] sm:$0xe] }
  0x35   :  { %v922_v13 = vsel %vm2204_vm9, %v913_v45, %v921_v11  ;;  %v940_v14 = vrot.slane %v938_v19, 5  ;;  %v943_v15 = vrot.slane %v941_v57, 6  ;;  %v201_v16 = vrot.slane %v199_v50, 4 }
  0x36   :  { %v1688_v22 = vcombine.low %v912_v61, %v922_v13  ;;  %v931_v26 = vrot.slane %v930_v5, 4  ;;  %v936_v29 = vrot.slane %v934_v6, 4  ;;  %v204_v31 = vrot.slane %v202_v8, 5  ;;  %v2396_v13 = vld [vmem:[%s2684_s0 + $0x38] sm:$0x3] }
  0x37   :  { %v944_v17 = vor.u32 %v943_v15, %v940_v14  ;;  %v208_v53 = vshll.u32 %v2343_v20, 16  ;;  %v212_v59 = vshrl.u32 %v2343_v20, 16  ;;  %v218_v62 = vshll.u32 %v2348_v1, 16 }
  0x38   :  { %1853 = vmatprep.mubr.msk.bf16.mxu0 %vm282_vm2, %v1688_v22  ;;  %v935_v33 = vsel %vm2204_vm9, %v931_v26, %v934_v6  ;;  %v205_v34 = vor.u32 %v204_v31, %v201_v16  ;;  %v223_v41 = vshrl.u32 %v2356_v24, 16  ;;  %v226_v51 = vshll.u32 %v2356_v24, 16 }
  0x39   :  { %v945_v45 = vsel %vm2204_vm9, %v936_v29, %v944_v17  ;;  %v210_v47 = vrot.slane %v208_v53, 5  ;;  %v214_v54 = vrot.slane %v212_v59, 4  ;;  %v220_v49 = vrot.slane %v218_v62, 5 }
  0x3a   :  { %v1689_v28 = vcombine.low %v935_v33, %v945_v45  ;;  %v206_v36 = vrot.slane %v205_v34, 4  ;;  %v225_v11 = vrot.slane %v223_v41, 4  ;;  %v228_v19 = vrot.slane %v226_v51, 5 }
  0x3b   :  { %v215_v57 = vor.u32 %v214_v54, %v210_v47  ;;  %v232_v50 = vshll.u32 %v2367_v56, 16  ;;  %v236_v61 = vshrl.u32 %v2367_v56, 16  ;;  %v242_v5 = vshll.u32 %v2372_v35, 16 }
  0x3c   :  { %1854 = vmatmul.mubr.msk.bf16.gmra.mrb[4].mxu0 %vm282_vm2, %v1689_v28  ;;  %v211_v6 = vsel %vm2113_vm6, %v206_v36, %v210_v47  ;;  %v229_v8 = vor.u32 %v228_v19, %v225_v11  ;;  %v947_v14 = vshrl.u32 %v2385_v55, 16  ;;  %v950_v15 = vshll.u32 %v2385_v55, 16  ;;  %v2414_v47 = vld [vmem:[%s2684_s0 + $0x3c] sm:$0xe] }
  0x3d   :  { %v216_v16 = vrot.slane %v215_v57, 4  ;;  %v234_v22 = vrot.slane %v232_v50, 5  ;;  %v238_v26 = vrot.slane %v236_v61, 4  ;;  %v244_v29 = vrot.slane %v242_v5, 5  ;;  %v2423_v5 = vld [vmem:[%s2684_s0 + $0x44] sm:$0x3] }
  0x3e   :  { %v230_v31 = vrot.slane %v229_v8, 4  ;;  %v949_v17 = vrot.slane %v947_v14, 5  ;;  %v952_v62 = vrot.slane %v950_v15, 6  ;;  %v955_v33 = vrot.slane %v164_v27, 5 }
  0x3f   :  { %v221_v34 = vsel %vm2113_vm6, %v216_v16, %v220_v49  ;;  %v239_v41 = vor.u32 %v238_v26, %v234_v22  ;;  %v956_v51 = vrot.slane %v160_v9, 6  ;;  %v961_v45 = vshrl.u32 %v2396_v13, 16  ;;  %v2436_v26 = vld [vmem:[%s2684_s0 + $0x48] sm:$0xe] }
  0x40   :  { %v1622_v54 = vcombine.low %v211_v6, %v221_v34  ;;  %v953_v28 = vor.u32 %v952_v62, %v949_v17  ;;  %v964_v36 = vshll.u32 %v2396_v13, 16  ;;  %v235_v27 = vsel %vm2113_vm6, %v230_v31, %v234_v22 }
  0x41   :  { %v240_v11 = vrot.slane %v239_v41, 4  ;;  %v957_v49 = vor.u32 %v956_v51, %v955_v33  ;;  %v963_v19 = vrot.slane %v961_v45, 5  ;;  %v970_v6 = vshrl.u32 %v2414_v47, 16  ;;  %v2452_v45 = vld [vmem:[%s2684_s0 + $0x50] sm:$0x3] }
  0x42   :  { %1801 = vmatprep.mubr.msk.bf16.mxu1 %vm282_vm2, %v1622_v54  ;;  %v954_v9 = vrot.slane %v953_v28, 4  ;;  %v966_v57 = vrot.slane %v964_v36, 6  ;;  %v973_v8 = vshll.u32 %v2414_v47, 16  ;;  %v978_v16 = vrot.slane %v188_v43, 5 }
  0x43   :  { %v245_v14 = vsel %vm2113_vm6, %v240_v11, %v244_v29  ;;  %v959_v15 = vrot.slane %v957_v49, 4  ;;  %v979_v22 = vrot.slane %v184_v40, 6  ;;  %v972_v33 = vrot.slane %v970_v6, 5 }
  0x44   :  { %v1623_v31 = vcombine.low %v235_v27, %v245_v14  ;;  %v958_v17 = vsel %vm2204_vm9, %v954_v9, %v957_v49  ;;  %v967_v62 = vor.u32 %v966_v57, %v963_v19  ;;  %v975_v60 = vrot.slane %v973_v8, 6  ;;  %v2458_v49 = vld [vmem:[%s2684_s0 + $0x54] sm:$0xe] }
  0x45   :  { %v980_v29 = vor.u32 %v979_v22, %v978_v16  ;;  %v984_v34 = vshrl.u32 %v2423_v5, 16  ;;  %v987_v43 = vshll.u32 %v2423_v5, 16  ;;  %v1634_v41 = vcombine.low %v2053_v21, %v2018_v4 }
  0x46   :  { %1802 = vmatmul.mubr.msk.bf16.gmra.mrb[12].mxu1 %vm282_vm2, %v1623_v31  ;;  %v968_v40 = vsel %vm2204_vm9, %v959_v15, %v967_v62  ;;  %v1635_v51 = vcombine.low %v2079_v39, %v2034_v12  ;;  %v993_v54 = vshrl.u32 %v2436_v26, 16  ;;  %v976_v36 = vor.u32 %v975_v60, %v972_v33 }
  0x47   :  { %v1690_v28 = vcombine.low %v958_v17, %v968_v40  ;;  %v982_v27 = vrot.slane %v980_v29, 4  ;;  %v986_v11 = vrot.slane %v984_v34, 5  ;;  %v989_v21 = vrot.slane %v987_v43, 6  ;;  %1809 = vmatprep.mubr.msk.bf16.mxu1 %vm282_vm2, %v1634_v41 }
  0x48   :  { %v995_v39 = vrot.slane %v993_v54, 5  ;;  %v996_v19 = vshll.u32 %v2436_v26, 16  ;;  %v1001_v9 = vrot.slane %v212_v59, 5  ;;  %v977_v57 = vrot.slane %v976_v36, 4 }
  0x49   :  { %1857 = vmatprep.mubr.msk.bf16.mxu0 %vm282_vm2, %v1690_v28  ;;  %v1002_v6 = vrot.slane %v208_v53, 6  ;;  %v1007_v8 = vshrl.u32 %v2452_v45, 16  ;;  %v1010_v14 = vshll.u32 %v2452_v45, 16  ;;  %v990_v15 = vor.u32 %v989_v21, %v986_v11  ;;  %v2476_v53 = vld [vmem:[%s2684_s0 + $0x5c] sm:$0x3] }
  0x4a   :  { %v998_v16 = vrot.slane %v996_v19, 6  ;;  %v1016_v22 = vshrl.u32 %v2458_v49, 16  ;;  %v1019_v31 = vshll.u32 %v2458_v49, 16  ;;  %v981_v17 = vsel %vm2204_vm9, %v977_v57, %v980_v29 }
  0x4b   :  { %v1003_v59 = vor.u32 %v1002_v6, %v1001_v9  ;;  %v1009_v62 = vrot.slane %v1007_v8, 5  ;;  %v1012_v33 = vrot.slane %v1010_v14, 6  ;;  %v991_v60 = vsel %vm2204_vm9, %v982_v27, %v990_v15  ;;  %v1211_v27 = vld [vmem:[%s2684_s0] sm:$0xc] }
  0x4c   :  { %v999_v34 = vor.u32 %v998_v16, %v995_v39  ;;  %v1018_v43 = vrot.slane %v1016_v22, 5  ;;  %v1021_v40 = vrot.slane %v1019_v31, 6  ;;  %v1691_v41 = vcombine.low %v981_v17, %v991_v60  ;;  %v1212_v16 = vld [vmem:[%s2684_s0 + $0xc] sm:$0xc]  ;;  %v2643_v8 = vld [vmem:[%s2685_s3] sm:$0xff] }
  0x4d   :  { %v1005_v54 = vrot.slane %v1003_v59, 4  ;;  %v1013_v28 = vor.u32 %v1012_v33, %v1009_v62  ;;  %v1024_v29 = vrot.slane %v236_v61, 5  ;;  %v1025_v21 = vrot.slane %v232_v50, 6  ;;  %v1213_v62 = vld [vmem:[%s2684_s0 + $0x18] sm:$0xc] }
  0x4e   :  { %1810 = vmatmul.mubr.msk.bf16.vlgmr.msra.gmra.mrb[0].mxu1 %vm282_vm2, %v1635_v51  ;;  %v1000_v36 = vrot.slane %v999_v34, 4  ;;  %v1022_v11 = vor.u32 %v1021_v40, %v1018_v43  ;;  %v1030_v19 = vshrl.u32 %v2476_v53, 16  ;;  %1858 = vmatmul.mubr.msk.bf16.gmra.mrb[8].mxu0 %vm282_vm2, %v1691_v41  ;;  %v1033_v51 = vshll.u32 %v2476_v53, 16 }
  0x4f   :  { %1887 = vmatpush3.bf16.msra.mxu1 %v1999_v0  ;;  %v1014_v61 = vsel %vm2204_vm9, %v1005_v54, %v1013_v28  ;;  %v1636_v39 = vcombine.low %v2150_v30, %v2104_v58  ;;  %v1026_v57 = vor.u32 %v1025_v21, %v1024_v29  ;;  %v1708_v15 = vrot.slane %v1211_v27, 10 }
  0x50   :  { %v1004_v50 = vsel %vm2204_vm9, %v1000_v36, %v1003_v59  ;;  %v1023_v9 = vrot.slane %v1022_v11, 4  ;;  %v1032_v6 = vrot.slane %v1030_v19, 5  ;;  %1886 = vmatprep.subr.bf16.mxu1 %v2008_v2  ;;  %v1035_v14 = vrot.slane %v1033_v51, 6 }
  0x51   :  { %v1692_v0 = vcombine.low %v1004_v50, %v1014_v61  ;;  %1813 = vmatprep.mubr.msk.bf16.mxu1 %vm282_vm2, %v1636_v39  ;;  %v1245_v30 = vrot.slane %v2018_v4, 6  ;;  %v1028_v31 = vrot.slane %v1026_v57, 4  ;;  %v1637_v17 = vcombine.low %v2167_v44, %v2126_v10 }
  0x52   :  { %v1027_v22 = vsel %vm2204_vm9, %v1023_v9, %v1026_v57  ;;  %v1248_v59 = vrot.slane %v2196_v25, 6  ;;  %v1036_v4 = vor.u32 %v1035_v14, %v1032_v6  ;;  %v1252_v34 = vrot.slane %v2034_v12, 6  ;;  %v1215_v9 = vld [vmem:[%s2684_s0 + $0x30] sm:$0xc] }
  0x53   :  { %1861 = vmatprep.mubr.msk.bf16.mxu0 %vm282_vm2, %v1692_v0  ;;  %v1246_v33 = vsel %vm2500_vm12, %v1708_v15, %v1245_v30  ;;  %v1247_v60 = vrot.slane %v1245_v30, 4  ;;  %1888 = vmatpush3.bf16.msra.mxu1 %v2008_v2  ;;  %v1709_v43 = vrot.slane %v1212_v16, 10  ;;  %v1255_v44 = vrot.slane %v2217_v42, 6  ;;  %v1216_v42 = vld [vmem:[%s2684_s0 + $0x3c] sm:$0xc] }
  0x54   :  { %v1638_v25 = vcombine.low %v2226_v23, %v2234_v46  ;;  %v1037_v40 = vsel %vm2204_vm9, %v1028_v31, %v1036_v4  ;;  %v1254_v54 = vrot.slane %v1252_v34, 4  ;;  %v1710_v28 = vrot.slane %v1213_v62, 10 }
  0x55   :  { %v1249_v41 = vsel %vm2500_vm12, %v1247_v60, %v1248_v59  ;;  %v1693_v29 = vcombine.low %v1027_v22, %v1037_v40  ;;  %v1259_v2 = vrot.slane %v2104_v58, 6  ;;  %v1262_v36 = vrot.slane %v2300_v63, 6  ;;  %v1217_v40 = vld [vmem:[%s2684_s0 + $0x48] sm:$0xc] }
  0x56   :  { %1814 = vmatmul.mubr.msk.bf16.gmra.mrb[4].mxu1 %vm282_vm2, %v1637_v17  ;;  %v1716_v12 = vcombine.low %v1246_v33, %v1249_v41  ;;  %v1266_v11 = vrot.slane %v2126_v10, 6  ;;  %v1253_v58 = vsel %vm2500_vm12, %v1709_v43, %v1252_v34  ;;  %v1256_v63 = vsel %vm2500_vm12, %v1254_v54, %v1255_v44 }
  0x57   :  { %1817 = vmatprep.mubr.msk.bf16.mxu1 %vm282_vm2, %v1638_v25  ;;  %1862 = vmatmul.mubr.msk.bf16.gmra.mrb[12].mxu0 %vm282_vm2, %v1693_v29  ;;  %v1261_v23 = vrot.slane %v1259_v2, 4  ;;  %v1639_v21 = vcombine.low %v2251_v3, %v2261_v18  ;;  %v1260_v19 = vsel %vm2500_vm12, %v1710_v28, %v1259_v2  ;;  %v1711_v61 = vrot.slane %v1214_v32, 10 }
  0x58   :  { %1869 = vmatprep.mubr.msk.bf16.mxu0 %vm282_vm2, %v1716_v12  ;;  %v1273_v10 = vrot.slane %v2234_v46, 6  ;;  %v1713_v51 = vrot.slane %v1216_v42, 10  ;;  %v1269_v39 = vrot.slane %v2322_v38, 6  ;;  %v1640_v50 = vcombine.low %v2328_v48, %v2343_v20 }
  0x59   :  { %v1263_v27 = vsel %vm2500_vm12, %v1261_v23, %v1262_v36  ;;  %v1280_v3 = vrot.slane %v2261_v18, 6  ;;  %v1283_v57 = vrot.slane %v2423_v5, 6  ;;  %v1717_v6 = vcombine.low %v1253_v58, %v1256_v63  ;;  %v1218_v63 = vld [vmem:[%s2684_s0 + $0x54] sm:$0xc] }
  0x5a   :  { %v1718_v0 = vcombine.low %v1260_v19, %v1263_v27  ;;  %v1268_v14 = vrot.slane %v1266_v11, 4  ;;  %v1660_v15 = vrot.slane %v2385_v55, 9  ;;  %v639_v48 = vrot.slane %v2234_v46, 5 }
  0x5b   :  { %v2565_v30 = vsel %vm2500_vm12, %v1713_v51, %v1280_v3  ;;  %v1282_v38 = vrot.slane %v1280_v3, 4  ;;  %v642_v16 = vrot.slane %v2241_v52, 5  ;;  %v1712_v22 = vrot.slane %v1215_v9, 10 }
  0x5c   :  { %v1275_v31 = vrot.slane %v1273_v10, 4  ;;  %v1276_v5 = vrot.slane %v2396_v13, 6  ;;  %v641_v17 = vrot.slane %v639_v48, 4  ;;  %v646_v59 = vrot.slane %v2261_v18, 5 }
  0x5d   :  { %v1284_v55 = vsel %vm2500_vm12, %v1282_v38, %v1283_v57  ;;  %v640_v52 = vsel %vm2026_vm3, %v1660_v15, %v639_v48  ;;  %v649_v62 = vrot.slane %v2276_v37, 5  ;;  %v1267_v13 = vsel %vm2500_vm12, %v1711_v61, %v1266_v11 }
  0x5e   :  { %1818 = vmatmul.mubr.msk.bf16.gmra.mrb[8].mxu1 %vm282_vm2, %v1639_v21  ;;  %v1721_v46 = vcombine.low %v2565_v30, %v1284_v55  ;;  %v1270_v4 = vsel %vm2500_vm12, %v1268_v14, %v1269_v39  ;;  %v643_v18 = vsel %vm2026_vm3, %v641_v17, %v642_v16  ;;  %v1641_v33 = vcombine.low %v2356_v24, %v2367_v56  ;;  %v2648_v55 = vld [vmem:[%s2685_s3 + $0x8] sm:$0xff] }
  0x5f   :  { %1821 = vmatprep.mubr.msk.bf16.mxu1 %vm282_vm2, %v1640_v50  ;;  %1870 = vmatmul.mubr.msk.bf16.vlgmr.msra.gmra.mrb[0].mxu0 %vm282_vm2, %v1717_v6  ;;  %v1274_v60 = vsel %vm2500_vm12, %v1712_v22, %v1273_v10  ;;  %v1277_v37 = vsel %vm2500_vm12, %v1275_v31, %v1276_v5  ;;  %v1287_v34 = vrot.slane %v2343_v20, 6  ;;  %v1661_v43 = vrot.slane %v2414_v47, 9 }
  0x60   :  { %1873 = vmatprep.mubr.msk.bf16.mxu0 %vm282_vm2, %v1718_v0  ;;  %v1668_v44 = vcombine.low %v640_v52, %v643_v18  ;;  %v648_v25 = vrot.slane %v646_v59, 4  ;;  %v653_v41 = vrot.slane %v2343_v20, 5  ;;  %v1719_v54 = vcombine.low %v1267_v13, %v1270_v4 }
  0x61   :  { %v1662_v24 = vrot.slane %v2436_v26, 9  ;;  %v656_v28 = vrot.slane %v2348_v1, 5  ;;  %v1720_v29 = vcombine.low %v1274_v60, %v1277_v37  ;;  %v1714_v2 = vrot.slane %v1217_v40, 10 }
  0x62   :  { %v655_v12 = vrot.slane %v653_v41, 4  ;;  %v1289_v36 = vrot.slane %v1287_v34, 4  ;;  %v1290_v47 = vrot.slane %v2452_v45, 6  ;;  %v647_v32 = vsel %vm2026_vm3, %v1661_v43, %v646_v59 }
  0x63   :  { %v650_v20 = vsel %vm2026_vm3, %v648_v25, %v649_v62  ;;  %v660_v26 = vrot.slane %v2367_v56, 5  ;;  %v654_v1 = vsel %vm2026_vm3, %v1662_v24, %v653_v41  ;;  %v1294_v45 = vrot.slane %v2367_v56, 6 }
  0x64   :  { %v657_v42 = vsel %vm2026_vm3, %v655_v12, %v656_v28  ;;  %v1669_v23 = vcombine.low %v647_v32, %v650_v20  ;;  %v1288_v11 = vsel %vm2500_vm12, %v1714_v2, %v1287_v34  ;;  %v1291_v58 = vsel %vm2500_vm12, %v1289_v36, %v1290_v47 }
  0x65   :  { %v1670_v21 = vcombine.low %v654_v1, %v657_v42  ;;  %v1663_v19 = vrot.slane %v2458_v49, 9  ;;  %v662_v27 = vrot.slane %v660_v26, 4  ;;  %v663_v61 = vrot.slane %v2372_v35, 5 }
  0x66   :  { %1822 = vmatmul.mubr.msk.bf16.gmra.mrb[12].mxu1 %vm282_vm2, %v1641_v33  ;;  %v1722_v10 = vcombine.low %v1288_v11, %v1291_v58  ;;  %v1715_v51 = vrot.slane %v1218_v63, 10  ;;  %v1296_v56 = vrot.slane %v1294_v45, 4  ;;  %v1297_v39 = vrot.slane %v2476_v53, 6 }
  0x67   :  { %1837 = vmatprep.mubr.msk.bf16.mxu1 %vm282_vm2, %v1668_v44  ;;  %1874 = vmatmul.mubr.msk.bf16.gmra.mrb[4].mxu0 %vm282_vm2, %v1719_v54  ;;  %v661_v50 = vsel %vm2026_vm3, %v1663_v19, %v660_v26  ;;  %v664_v9 = vsel %vm2026_vm3, %v662_v27, %v663_v61  ;;  %vm1586_vm13 = vcmask 1041409   ;;  %vm1589_vm14 = vcmask 1042434  }
  0x68   :  { %1877 = vmatprep.mubr.msk.bf16.mxu0 %vm282_vm2, %v1720_v29  ;;  %v1295_v35 = vsel %vm2500_vm12, %v1715_v51, %v1294_v45  ;;  %v1298_v49 = vsel %vm2500_vm12, %v1296_v56, %v1297_v39  ;;  %v1671_v53 = vcombine.low %v661_v50, %v664_v9  ;;  %vm1592_vm15 = vcmask 1043459  }
  0x69   :  { %v1723_v3 = vcombine.low %v1295_v35, %v1298_v49  ;;  %vm1595_vm0 = vcmask 1044484   ;;  %vm1598_vm1 = vcmask 1045509   ;;  %vm1604_vm3 = vcmask 1047559  }
  0x6e   :  { %1838 = vmatmul.mubr.msk.bf16.vlgmr.msra.gmra.mrb[8].mxu1 %vm282_vm2, %v1669_v23 }
  0x6f   :  { %1841 = vmatprep.mubr.msk.bf16.mxu1 %vm282_vm2, %v1670_v21  ;;  %1878 = vmatmul.mubr.msk.bf16.gmra.mrb[8].mxu0 %vm282_vm2, %v1721_v46 }
  0x70   :  { %1881 = vmatprep.mubr.msk.bf16.mxu0 %vm282_vm2, %v1722_v10 }
  0x76   :  { %1842 = vmatmul.mubr.msk.bf16.gmra.mrb[12].mxu1 %vm282_vm2, %v1671_v53 }
  0x77   :  { %1882 = vmatmul.mubr.msk.bf16.gmra.mrb[12].mxu0 %vm282_vm2, %v1723_v3  ;;  %v2661_v3 = vld [vmem:[%s2686_s2] ss:$0 sm:$0xff]  ;;  %vm1601_vm2 = vcmask 1046534  }
 0x121   :  { %v1811_v57 = vpop.f32.mrb[0].mxu1 }
 0x122   :  { %v514_v6 = vpop.f32.mrb[1].mxu1 }
 0x123   :  { %v1812_v7 = vpop.f32.mrb[2].mxu1 }
 0x124   :  { %v517_v0 = vpop.f32.mrb[3].mxu1 }
 0x129   :  { %v1815_v14 = vpop.f32.mrb[4].mxu1 }
 0x12a   :  { %v530_v15 = vpop.f32.mrb[5].mxu1 }
 0x12b   :  { %v1816_v30 = vpop.f32.mrb[6].mxu1 }
 0x12c   :  { %v533_v38 = vpop.f32.mrb[7].mxu1 }
 0x132   :  { %v1871_v48 = vpop.f32.mrb[0].mxu0 }
 0x133   :  { %v1889_v16 = vadd.f32 %v1871_v48, %v1811_v57  ;;  %v1393_v22 = vpop.f32.mrb[1].mxu0 }
 0x134   :  { %v1890_v31 = vadd.f32 %v1393_v22, %v514_v6  ;;  %v1872_v5 = vpop.f32.mrb[2].mxu0 }
 0x135   :  { %v1891_v17 = vadd.f32 %v1872_v5, %v1812_v7  ;;  %v1396_v59 = vpop.f32.mrb[3].mxu0  ;;  %v1476_v52 = vadd.f32 %v1889_v16, %v2643_v8 }
 0x136   :  { %v1892_v46 = vadd.f32 %v1396_v59, %v517_v0  ;;  %v1474_v13 = vadd.f32 %v1890_v31, %v2643_v8 }
 0x137   :  { %v1477_v62 = vadd.f32 %v1891_v17, %v2648_v55 }
 0x138   :  { %v1475_v4 = vadd.f32 %v1892_v46, %v2648_v55 }
 0x139   :  { %v1497_v18 = vmax.f32 %v1476_v52, %v1477_v62 }
 0x13a   :  { %v1490_v33 = vmax.f32 %v1474_v13, %v1475_v4  ;;  %v1875_v60 = vpop.f32.mrb[4].mxu0 }
 0x13b   :  { %v1498_v37 = vrot.slane %v1497_v18, 4  ;;  %v1893_v34 = vadd.f32 %v1875_v60, %v1815_v14  ;;  %v1409_v43 = vpop.f32.mrb[5].mxu0 }
 0x13c   :  { %v1491_v44 = vrot.slane %v1490_v33, 4  ;;  %v1894_v25 = vadd.f32 %v1409_v43, %v530_v15  ;;  %v1876_v40 = vpop.f32.mrb[6].mxu0 }
 0x13d   :  { %v1499_v41 = vmax.f32 %v1497_v18, %v1498_v37  ;;  %v1895_v54 = vadd.f32 %v1876_v40, %v1816_v30  ;;  %v1412_v24 = vpop.f32.mrb[7].mxu0  ;;  %v1480_v2 = vadd.f32 %v1893_v34, %v2643_v8 }
 0x13e   :  { %v1492_v28 = vmax.f32 %v1490_v33, %v1491_v44  ;;  %v1896_v29 = vadd.f32 %v1412_v24, %v533_v38  ;;  %v1478_v32 = vadd.f32 %v1894_v25, %v2643_v8 }
 0x13f   :  { %v1500_v12 = vrot.slane %v1499_v41, 2  ;;  %v1481_v36 = vadd.f32 %v1895_v54, %v2648_v55 }
 0x140   :  { %v1493_v47 = vrot.slane %v1492_v28, 2  ;;  %v1479_v20 = vadd.f32 %v1896_v29, %v2648_v55 }
 0x141   :  { %v1839_v26 = vpop.f32.mrb[8].mxu1  ;;  %v1501_v1 = vmax.f32 %v1499_v41, %v1500_v12  ;;  %v1511_v42 = vmax.f32 %v1480_v2, %v1481_v36 }
 0x142   :  { %v791_v45 = vpop.f32.mrb[9].mxu1  ;;  %v1494_v23 = vmax.f32 %v1492_v28, %v1493_v47  ;;  %v1504_v11 = vmax.f32 %v1478_v32, %v1479_v20  ;;  %v1879_v58 = vpop.f32.mrb[8].mxu0 }
 0x143   :  { %v1840_v63 = vpop.f32.mrb[10].mxu1  ;;  %v1502_v21 = vrot.slane %v1501_v1, 1  ;;  %v1512_v19 = vrot.slane %v1511_v42, 4  ;;  %v1425_v27 = vpop.f32.mrb[9].mxu0  ;;  %v1897_v61 = vadd.f32 %v1879_v58, %v1839_v26 }
 0x144   :  { %v794_v10 = vpop.f32.mrb[11].mxu1  ;;  %v1495_v51 = vrot.slane %v1494_v23, 1  ;;  %v1505_v56 = vrot.slane %v1504_v11, 4  ;;  %v1880_v39 = vpop.f32.mrb[10].mxu0  ;;  %v1898_v50 = vadd.f32 %v1425_v27, %v791_v45 }
 0x145   :  { %v1503_v9 = vmax.f32 %v1501_v1, %v1502_v21  ;;  %v1513_v35 = vmax.f32 %v1511_v42, %v1512_v19  ;;  %v1428_v49 = vpop.f32.mrb[11].mxu0  ;;  %v1899_v53 = vadd.f32 %v1880_v39, %v1840_v63  ;;  %v1484_v15 = vadd.f32 %v1897_v61, %v2643_v8 }
 0x146   :  { %v1496_v57 = vmax.f32 %v1494_v23, %v1495_v51  ;;  %v1506_v6 = vmax.f32 %v1504_v11, %v1505_v56  ;;  %v1900_v7 = vadd.f32 %v1428_v49, %v794_v10  ;;  %v1482_v16 = vadd.f32 %v1898_v50, %v2643_v8 }
 0x147   :  { %v1547_v0 = vmax.f32 %v1503_v9, -1e+30  ;;  %v1514_v14 = vrot.slane %v1513_v35, 2  ;;  %v1485_v30 = vadd.f32 %v1899_v53, %v2648_v55 }
 0x148   :  { %v1546_v38 = vmax.f32 %v1496_v57, -1e+30  ;;  %v1507_v48 = vrot.slane %v1506_v6, 2  ;;  %v1483_v22 = vadd.f32 %v1900_v7, %v2648_v55 }
 0x149   :  { %v1843_v31 = vpop.f32.mrb[12].mxu1  ;;  %v1562_v5 = vadd.f32 %v2661_v3, %v1547_v0  ;;  %v1515_v17 = vmax.f32 %v1513_v35, %v1514_v14  ;;  %v1525_v59 = vmax.f32 %v1484_v15, %v1485_v30 }
 0x14a   :  { %v807_v46 = vpop.f32.mrb[13].mxu1  ;;  %v1561_v52 = vadd.f32 %v2661_v3, %v1546_v38  ;;  %v1508_v62 = vmax.f32 %v1506_v6, %v1507_v48  ;;  %v1518_v13 = vmax.f32 %v1482_v16, %v1483_v22  ;;  %v1883_v4 = vpop.f32.mrb[12].mxu0 }
 0x14b   :  { %v1844_v18 = vpop.f32.mrb[14].mxu1  ;;  %v1570_v33 = vmax.f32 %v1562_v5, 0.0  ;;  %v1516_v60 = vrot.slane %v1515_v17, 1  ;;  %v1526_v37 = vrot.slane %v1525_v59, 4  ;;  %v1441_v34 = vpop.f32.mrb[13].mxu0  ;;  %v1901_v43 = vadd.f32 %v1883_v4, %v1843_v31 }
 0x14c   :  { %v810_v44 = vpop.f32.mrb[15].mxu1  ;;  %v1569_v25 = vmax.f32 %v1561_v52, 0.0  ;;  %v1509_v40 = vrot.slane %v1508_v62, 1  ;;  %v1519_v41 = vrot.slane %v1518_v13, 4  ;;  %v1884_v54 = vpop.f32.mrb[14].mxu0  ;;  %v1902_v24 = vadd.f32 %v1441_v34, %v807_v46 }
 0x14d   :  { %v1585_v28 = vrot.slane %v1570_v33, 7  ;;  %v1517_v29 = vmax.f32 %v1515_v17, %v1516_v60  ;;  %v1527_v12 = vmax.f32 %v1525_v59, %v1526_v37  ;;  %v1444_v2 = vpop.f32.mrb[15].mxu0  ;;  %v1903_v32 = vadd.f32 %v1884_v54, %v1844_v18 }
 0x14e   :  { %v1510_v36 = vmax.f32 %v1508_v62, %v1509_v40  ;;  %v1520_v47 = vmax.f32 %v1518_v13, %v1519_v41  ;;  %v1904_v42 = vadd.f32 %v1444_v2, %v810_v44  ;;  %v1488_v11 = vadd.f32 %v1901_v43, %v2643_v8 }
 0x14f   :  { %v1587_v20 = vsel %vm1586_vm13, %v1585_v28, %v1569_v25  ;;  %v1549_v26 = vmax.f32 %v1517_v29, -1e+30  ;;  %v1528_v1 = vrot.slane %v1527_v12, 2  ;;  %v1489_v58 = vadd.f32 %v1903_v32, %v2648_v55 }
 0x150   :  { %v1548_v45 = vmax.f32 %v1510_v36, -1e+30  ;;  %v1521_v23 = vrot.slane %v1520_v47, 2  ;;  %v1486_v19 = vadd.f32 %v1902_v24, %v2643_v8  ;;  %v1487_v27 = vadd.f32 %v1904_v42, %v2648_v55 }
 0x151   :  { %v1564_v63 = vadd.f32 %v2661_v3, %v1549_v26  ;;  %v1529_v21 = vmax.f32 %v1527_v12, %v1528_v1  ;;  %v1539_v51 = vmax.f32 %v1488_v11, %v1489_v58 }
 0x152   :  { %v1563_v61 = vadd.f32 %v2661_v3, %v1548_v45  ;;  %v1522_v10 = vmax.f32 %v1520_v47, %v1521_v23  ;;  %v1532_v50 = vmax.f32 %v1486_v19, %v1487_v27 }
 0x153   :  { %v1572_v56 = vmax.f32 %v1564_v63, 0.0  ;;  %v1530_v39 = vrot.slane %v1529_v21, 1  ;;  %v1540_v49 = vrot.slane %v1539_v51, 4 }
 0x154   :  { %v1571_v9 = vmax.f32 %v1563_v61, 0.0  ;;  %v1523_v35 = vrot.slane %v1522_v10, 1  ;;  %v1533_v57 = vrot.slane %v1532_v50, 4 }
 0x155   :  { %v1531_v53 = vmax.f32 %v1529_v21, %v1530_v39  ;;  %v1541_v0 = vmax.f32 %v1539_v51, %v1540_v49  ;;  %v1591_v8 = vrot.slane %v1572_v56, 5 }
 0x156   :  { %v1588_v6 = vrot.slane %v1571_v9, 6  ;;  %v1524_v7 = vmax.f32 %v1522_v10, %v1523_v35  ;;  %v1534_v55 = vmax.f32 %v1532_v50, %v1533_v57 }
 0x157   :  { %v1551_v14 = vmax.f32 %v1531_v53, -1e+30  ;;  %v1542_v38 = vrot.slane %v1541_v0, 2 }
 0x158   :  { %v1590_v15 = vsel %vm1589_vm14, %v1588_v6, %v1587_v20  ;;  %v1550_v30 = vmax.f32 %v1524_v7, -1e+30  ;;  %v1535_v22 = vrot.slane %v1534_v55, 2 }
 0x159   :  { %v1566_v48 = vadd.f32 %v2661_v3, %v1551_v14  ;;  %v1593_v16 = vsel %vm1592_vm15, %v1591_v8, %v1590_v15  ;;  %v1543_v5 = vmax.f32 %v1541_v0, %v1542_v38 }
 0x15a   :  { %v1565_v31 = vadd.f32 %v2661_v3, %v1550_v30  ;;  %v1536_v59 = vmax.f32 %v1534_v55, %v1535_v22 }
 0x15b   :  { %v1574_v17 = vmax.f32 %v1566_v48, 0.0  ;;  %v1544_v52 = vrot.slane %v1543_v5, 1 }
 0x15c   :  { %v1573_v46 = vmax.f32 %v1565_v31, 0.0  ;;  %v1537_v62 = vrot.slane %v1536_v59, 1 }
 0x15d   :  { %v1545_v4 = vmax.f32 %v1543_v5, %v1544_v52  ;;  %v1597_v18 = vrot.slane %v1574_v17, 3 }
 0x15e   :  { %v1594_v13 = vrot.slane %v1573_v46, 4  ;;  %v1538_v33 = vmax.f32 %v1536_v59, %v1537_v62 }
 0x15f   :  { %v1553_v37 = vmax.f32 %v1545_v4, -1e+30 }
 0x160   :  { %v1596_v60 = vsel %vm1595_vm0, %v1594_v13, %v1593_v16  ;;  %v1552_v34 = vmax.f32 %v1538_v33, -1e+30 }
 0x161   :  { %v1599_v43 = vsel %vm1598_vm1, %v1597_v18, %v1596_v60  ;;  %v1568_v44 = vadd.f32 %v2661_v3, %v1553_v37 }
 0x162   :  { %v1567_v25 = vadd.f32 %v2661_v3, %v1552_v34 }
 0x163   :  { %v1576_v40 = vmax.f32 %v1568_v44, 0.0 }
 0x164   :  { %v1575_v41 = vmax.f32 %v1567_v25, 0.0 }
 0x165   :  { %v1603_v24 = vrot.slane %v1576_v40, 1 }
 0x166   :  { %v1600_v54 = vrot.slane %v1575_v41, 2 }
 0x168   :  { %v1602_v28 = vsel %vm1601_vm2, %v1600_v54, %v1599_v43 }
 0x169   :  { %v1605_v29 = vsel %vm1604_vm3, %v1603_v24, %v1602_v28 }
 0x16a   :  { %1607 = vst [vmem:[%s2687_s4] sm:$0xff] %v1605_v29 }

</bundles_post_ra>
